<compile_context>
chip_gen: v7x
topology: tpu7x:2x2x1
jax: 0.10.0
libtpu: 0.0.40
codegen_flags: <defaults>
</compile_context>

<pallas_src>
import jax
import jax.numpy as jnp
from jax.experimental import pallas as pl
from jax.experimental.pallas import tpu as pltpu


def _round_up(n, m):
    return ((n + m - 1) // m) * m


def _pick_batch_tile(batch, block_batch):
    """Batch tile: multiple of 16; >=2 tiles when batch is large enough (v7x)."""
    if batch <= 16:
        return _round_up(batch, 8)
    half = _round_up(-(-batch // 2), 16)          # ceil(batch/2) rounded to 16
    return min(_round_up(block_batch, 16), half)


def mlp_kernel(x_ref, w1_ref, b1_ref, w2_ref, b2_ref, o_ref):
    # hidden = relu(x @ W1 + b1): bf16 operands into the MXU, f32 accumulation.
    xb = x_ref[...].astype(jnp.bfloat16)
    h = jnp.dot(xb, w1_ref[...], preferred_element_type=jnp.float32)
    h = jnp.maximum(h + b1_ref[...], 0.0)          # bias + ReLU in f32
    # out = h @ W2 + b2: re-cast h to bf16 for the MXU, accumulate in f32.
    o = jnp.dot(h.astype(jnp.bfloat16), w2_ref[...],
                preferred_element_type=jnp.float32)
    o_ref[...] = (o + b2_ref[...]).astype(o_ref.dtype)


def make_net_forward(w1, b1, w2, b2, *, block_batch=1024):
    """Pad/cast the parameters once; return a jitted forward: x -> f32 output.

    w1: [n_feature, n_hidden], w2: [n_hidden, n_output] (torch Linear weight.T),
    b1/b2: (out,) or (1, out).
    """
    w1 = jnp.asarray(w1)
    w2 = jnp.asarray(w2)
    n_feature, n_hidden = w1.shape
    n_output = w2.shape[1]

    # Lane-pad only the hidden dim (internal to the kernel, padding cost paid once).
    # Padded hidden units are relu(0 + 0) = 0 and multiply zero W2 rows -> exact.
    hid_p = _round_up(n_hidden, 128)

    w1p = jnp.zeros((n_feature, hid_p), jnp.bfloat16).at[:, :n_hidden].set(
        w1.astype(jnp.bfloat16))
    b1p = jnp.zeros((1, hid_p), jnp.float32).at[:, :n_hidden].set(
        jnp.asarray(b1, jnp.float32).reshape(1, n_hidden))
    w2p = jnp.zeros((hid_p, n_output), jnp.bfloat16).at[:n_hidden, :].set(
        w2.astype(jnp.bfloat16))
    b2p = jnp.asarray(b2, jnp.float32).reshape(1, n_output)

    resident_bytes = (w1p.size + w2p.size) * 2 + (b1p.size + b2p.size) * 4

    @jax.jit
    def forward(x):
        batch, nf = x.shape
        assert nf == n_feature, "x feature dim mismatch"

        tb = _pick_batch_tile(batch, block_batch)
        grid = (pl.cdiv(batch, tb),)

        # Streamed tiles are double-buffered; residents are single-buffered.
        stream_bytes = 2 * tb * (n_feature * x.dtype.itemsize + n_output * 4)
        vmem_limit = int(min(100 * 2**20,
                             max(32 * 2**20, 2 * (resident_bytes + stream_bytes))))

        return pl.pallas_call(
            mlp_kernel,
            out_shape=jax.ShapeDtypeStruct((batch, n_output), jnp.float32),
            grid=grid,
            in_specs=[
                # x: streamed + double-buffered per batch tile (last partial tile
                # is boundary-masked by Pallas; OOB rows never reach the output).
                pl.BlockSpec((tb, n_feature), lambda i: (i, 0)),
                # Weights/biases: whole array resident in VMEM, fetched once,
                # single buffer (no 2x double-buffer allocation).
                pl.BlockSpec(memory_space=pltpu.MemorySpace.VMEM),  # W1
                pl.BlockSpec(memory_space=pltpu.MemorySpace.VMEM),  # b1
                pl.BlockSpec(memory_space=pltpu.MemorySpace.VMEM),  # W2
                pl.BlockSpec(memory_space=pltpu.MemorySpace.VMEM),  # b2
            ],
            out_specs=pl.BlockSpec((tb, n_output), lambda i: (i, 0)),
            compiler_params=pltpu.CompilerParams(
                # Independent batch tiles -> shard the grid across TensorCores (v7x).
                dimension_semantics=("parallel",),
                vmem_limit_bytes=vmem_limit,
            ),
        )(x, w1p, b1p, w2p, b2p)

    return forward


if __name__ == "__main__":
    batch, n_feature, n_hidden, n_output = 8, 32, 64, 8

    key = jax.random.PRNGKey(0)
    kx, kw1, kb1, kw2, kb2 = jax.random.split(key, 5)

    x = jax.random.normal(kx, (batch, n_feature), dtype=jnp.float32)
    # Torch-Linear-like uniform init, stored as [in, out] (= torch weight.T).
    s1 = 1.0 / (n_feature ** 0.5)
    w1 = jax.random.uniform(kw1, (n_feature, n_hidden), jnp.float32, -s1, s1)
    b1 = jax.random.uniform(kb1, (n_hidden,), jnp.float32, -s1, s1)
    s2 = 1.0 / (n_hidden ** 0.5)
    w2 = jax.random.uniform(kw2, (n_hidden, n_output), jnp.float32, -s2, s2)
    b2 = jax.random.uniform(kb2, (n_output,), jnp.float32, -s2, s2)

    forward = make_net_forward(w1, b1, w2, b2)
    out = forward(x)
    jax.block_until_ready(out)
    assert out.shape == (batch, n_output)

    # Reference with the same bf16-operand / f32-accumulate quantization as the kernel.
    xb, w1b, w2b = (a.astype(jnp.bfloat16) for a in (x, w1, w2))
    h_ref = jnp.maximum(
        jnp.dot(xb, w1b, preferred_element_type=jnp.float32) + b1[None, :], 0.0)
    ref = jnp.dot(h_ref.astype(jnp.bfloat16), w2b,
                  preferred_element_type=jnp.float32) + b2[None, :]
    assert jnp.allclose(out, ref, atol=1e-4, rtol=1e-4)

    # Loose sanity check against the pure-f32 forward (bf16 error budget).
    ref_f32 = jnp.maximum(x @ w1 + b1[None, :], 0.0) @ w2 + b2[None, :]
    assert jnp.allclose(out, ref_f32, atol=5e-2, rtol=5e-2)

    print("KERNEL_OK")
</pallas_src>

<mosaic_0001>
module attributes {stable_mosaic.version = 11 : i64} {
  func.func @mlp_kernel(%arg0: i32, %arg1: memref<8x32xf32, #tpu.memory_space<vmem>>, %arg2: memref<32x128xbf16, #tpu.memory_space<vmem>>, %arg3: memref<1x128xf32, #tpu.memory_space<vmem>>, %arg4: memref<128x8xbf16, #tpu.memory_space<vmem>>, %arg5: memref<1x8xf32, #tpu.memory_space<vmem>>, %arg6: memref<8x8xf32, #tpu.memory_space<vmem>>) attributes {dimension_semantics = [#tpu.dimension_semantics<parallel>], iteration_bounds = array<i64: 1>, scalar_prefetch = 0 : i64, scratch_operands = 0 : i64, tpu.core_type = #tpu.core_type<tc>, window_params = [{transform_indices = @transform_0, window_bounds = array<i64: 8, 32>}, {pipeline_mode = #tpu.pipeline_mode<synchronous>, transform_indices = @transform_1, window_bounds = array<i64: 32, 128>}, {pipeline_mode = #tpu.pipeline_mode<synchronous>, transform_indices = @transform_2, window_bounds = array<i64: 1, 128>}, {pipeline_mode = #tpu.pipeline_mode<synchronous>, transform_indices = @transform_3, window_bounds = array<i64: 128, 8>}, {pipeline_mode = #tpu.pipeline_mode<synchronous>, transform_indices = @transform_4, window_bounds = array<i64: 1, 8>}, {transform_indices = @transform_5, window_bounds = array<i64: 8, 8>}]} {
    %c0 = arith.constant 0 : index
    %c0_0 = arith.constant 0 : index
    %0 = vector.load %arg1[%c0, %c0_0] : memref<8x32xf32, #tpu.memory_space<vmem>>, vector<8x32xf32>
    %1 = arith.truncf %0 : vector<8x32xf32> to vector<8x32xbf16>
    %c0_1 = arith.constant 0 : index
    %c0_2 = arith.constant 0 : index
    %2 = vector.load %arg2[%c0_1, %c0_2] : memref<32x128xbf16, #tpu.memory_space<vmem>>, vector<32x128xbf16>
    %cst = arith.constant dense<0.000000e+00> : vector<8x128xf32>
    %3 = tpu.matmul %1, %2, %cst {dimension_numbers = #tpu.dot_dimension_numbers<[1], [0], [0], [1], [0, 0, 1, 1], [], []>} : vector<8x32xbf16>, vector<32x128xbf16>, vector<8x128xf32> -> vector<8x128xf32>
    %c0_3 = arith.constant 0 : index
    %c0_4 = arith.constant 0 : index
    %4 = vector.load %arg3[%c0_3, %c0_4] : memref<1x128xf32, #tpu.memory_space<vmem>>, vector<1x128xf32>
    %5 = vector.broadcast %4 : vector<1x128xf32> to vector<8x128xf32>
    %6 = arith.addf %3, %5 : vector<8x128xf32>
    %cst_5 = arith.constant 0.000000e+00 : f32
    %7 = vector.broadcast %cst_5 : f32 to vector<8x128xf32>
    %8 = arith.maximumf %6, %7 : vector<8x128xf32>
    %9 = arith.truncf %8 : vector<8x128xf32> to vector<8x128xbf16>
    %c0_6 = arith.constant 0 : index
    %c0_7 = arith.constant 0 : index
    %10 = vector.load %arg4[%c0_6, %c0_7] : memref<128x8xbf16, #tpu.memory_space<vmem>>, vector<128x8xbf16>
    %cst_8 = arith.constant dense<0.000000e+00> : vector<8x8xf32>
    %11 = tpu.matmul %9, %10, %cst_8 {dimension_numbers = #tpu.dot_dimension_numbers<[1], [0], [0], [1], [0, 0, 1, 1], [], []>} : vector<8x128xbf16>, vector<128x8xbf16>, vector<8x8xf32> -> vector<8x8xf32>
    %c0_9 = arith.constant 0 : index
    %c0_10 = arith.constant 0 : index
    %12 = vector.load %arg5[%c0_9, %c0_10] : memref<1x8xf32, #tpu.memory_space<vmem>>, vector<1x8xf32>
    %13 = vector.broadcast %12 : vector<1x8xf32> to vector<8x8xf32>
    %14 = arith.addf %11, %13 : vector<8x8xf32>
    %c0_11 = arith.constant 0 : index
    %c0_12 = arith.constant 0 : index
    %15 = vector.load %arg6[%c0_11, %c0_12] : memref<8x8xf32, #tpu.memory_space<vmem>>, vector<8x8xf32>
    tpu.vector_store %arg6[%c0_11, %c0_12], %14 {strides = array<i32>} : memref<8x8xf32, #tpu.memory_space<vmem>>, vector<8x8xf32>,
    return
  }
  func.func @transform_0(%arg0: i32) -> (i32, i32) {
    %c0_i32 = arith.constant 0 : i32
    %c0_i32_0 = arith.constant 0 : i32
    return %arg0, %c0_i32 : i32, i32
  }
  func.func @transform_1(%arg0: i32) -> (i32, i32) {
    %c0_i32 = arith.constant 0 : i32
    %c0_i32_0 = arith.constant 0 : i32
    %c0_i32_1 = arith.constant 0 : i32
    return %c0_i32, %c0_i32_0 : i32, i32
  }
  func.func @transform_2(%arg0: i32) -> (i32, i32) {
    %c0_i32 = arith.constant 0 : i32
    %c0_i32_0 = arith.constant 0 : i32
    %c0_i32_1 = arith.constant 0 : i32
    return %c0_i32, %c0_i32_0 : i32, i32
  }
  func.func @transform_3(%arg0: i32) -> (i32, i32) {
    %c0_i32 = arith.constant 0 : i32
    %c0_i32_0 = arith.constant 0 : i32
    %c0_i32_1 = arith.constant 0 : i32
    return %c0_i32, %c0_i32_0 : i32, i32
  }
  func.func @transform_4(%arg0: i32) -> (i32, i32) {
    %c0_i32 = arith.constant 0 : i32
    %c0_i32_0 = arith.constant 0 : i32
    %c0_i32_1 = arith.constant 0 : i32
    return %c0_i32, %c0_i32_0 : i32, i32
  }
  func.func @transform_5(%arg0: i32) -> (i32, i32) {
    %c0_i32 = arith.constant 0 : i32
    %c0_i32_0 = arith.constant 0 : i32
    return %arg0, %c0_i32 : i32, i32
  }
}

</mosaic_0001>

<bundles_post_ra>
// kernel: forward.1
= control target key start
LH: loop header
LB: loop body
LE: loop exit
PB: predicated region body
PF: predicated region fallthrough
CT: control target
= control target key end

     0   :  { %10 = vsyncpa [#allocation3], 0  ;;  %s482_s0 = inlined_call_operand.hbm [shape: f32[8,32], index: 0, kind: input, shape index: {}]   ;;  %s483_s1 = inlined_call_operand.vmem [shape: bf16[32,128], index: 1, kind: input, shape index: {}]   ;;  %s484_s2 = inlined_call_operand.vmem [shape: f32[1,128], index: 2, kind: input, shape index: {}]   ;;  %s485_s3 = inlined_call_operand.hbm [shape: bf16[128,8], index: 3, kind: input, shape index: {}]   ;;  %s486_s4 = inlined_call_operand.vmem [shape: f32[1,8], index: 4, kind: input, shape index: {}]   ;;  %s487_s5 = inlined_call_operand.hbm [shape: f32[8,8], index: 5, kind: output, shape index: {}]  }
   0x1   :  { %11 = vsyncpa [#allocation6], 0 }
   0x2   :  { %12 = vsyncpa [#allocation4], 0  ;;  %s390_s18 = smov [#allocation2]   ;;  %s391_s20 = smov [#allocation5]  }
   0x3   :  { %s19_s19 = sshll.u32 %s390_s18, 4  ;;  %s32_s21 = sshll.u32 %s391_s20, 4  ;;  %s20_s19 = int_to_ptr.vmem [resolvable:$true] %s19_s19  ;;  %s427_s21 = int_to_ptr.vmem [resolvable:$true] %s32_s21 }
   0x4   :  { %s318_s24 = scalar_lea.hbm %s482_s0, 128 }
   0x5   :  { %p319_p0 = scmp.ne.s32.totalorder %s482_s0, %s318_s24  ;;  %p322_p1 = scmp.lt.u32.totalorder %s318_s24, %s482_s0 }
   0x7   :  { %p324_p2 = pnand %p322_p1, %p319_p0 }
   0x9   :  { %327 = shalt.err (!%p324_p2)
}
   0xa   :  { %s328_s29 = scalar_lea.vmem %s20_s19, 128  ;;  %p333_p4 = scmp.lt.s32.totalorder %s20_s19, %s20_s19 }
   0xb   :  { %p329_p3 = scmp.ne.s32.totalorder %s20_s19, %s328_s29  ;;  %p334_p5 = scmp.lt.s32.totalorder %s328_s29, %s328_s29 }
   0xd   :  { %p335_p6 = por %p334_p5, %p333_p4 }
   0xf   :  { %p336_p7 = pnand %p335_p6, %p329_p3 }
  0x11   :  { %339 = shalt.err (!%p336_p7)
}
  0x12   :  { %22 = dma.hbm_to_vmem [thread:$0]  %s482_s0, 128, %s20_s19, [#allocation3]  }
  0x13   :  { %s340_s9 = scalar_lea.hbm %s485_s3, 1024 }
  0x14   :  { %p341_p8 = scmp.ne.s32.totalorder %s485_s3, %s340_s9  ;;  %p344_p9 = scmp.lt.u32.totalorder %s340_s9, %s485_s3 }
  0x16   :  { %p346_p10 = pnand %p344_p9, %p341_p8 }
  0x18   :  { %349 = shalt.err (!%p346_p10)
}
  0x19   :  { %s350_s14 = scalar_lea.vmem %s427_s21, 1024  ;;  %p355_p12 = scmp.lt.s32.totalorder %s427_s21, %s427_s21 }
  0x1a   :  { %p351_p11 = scmp.ne.s32.totalorder %s427_s21, %s350_s14  ;;  %p356_p13 = scmp.lt.s32.totalorder %s350_s14, %s350_s14 }
  0x1c   :  { %p357_p0 = por %p356_p13, %p355_p12 }
  0x1e   :  { %p358_p1 = pnand %p357_p0, %p351_p11 }
  0x20   :  { %361 = shalt.err (!%p358_p1)
}
  0x21   :  { %s392_s0 = smov 64   ;;  %s393_s15 = smov 4  }
  0x22   :  { %38 = dma.hbm_to_vmem [thread:$0]  %s485_s3, 1024, %s427_s21, [#allocation6], %s392_s0, %s392_s0, %s393_s15  }
  0x23   :  { %384 = dma.done.wait [#allocation3], 128  }
  0x24   :  { %385 = vsyncadd [#allocation3], 4294967168 }
  0x25   :  { %386 = dma.done.wait [#allocation6], 1024  }
  0x26   :  { %387 = vsyncadd [#allocation6], 4294966272  ;;  %v394_v0 = vmov 0.0   ;;  %vm395_vm0 = vmmov 0   ;;  %v308_v1 = vld [vmem:[%s483_s1] sm:$0xff]   ;;  %v309_v2 = vld [vmem:[%s483_s1 + $0x8] sm:$0xff]  }
  0x27   :  { %273 = vmatprep.subr.bf16.mxu0 %v394_v0  ;;  %277 = vmatprep.mubr.msk.bf16.mxu0 %vm395_vm0, %v394_v0  ;;  %v48_v3 = vld [vmem:[#allocation2] sm:$0xff]  ;;  %v310_v4 = vld [vmem:[#allocation5] sm:$0xff]   ;;  %v311_v6 = vld [vmem:[#allocation5 + $0x8] sm:$0xff]   ;;  %vm73_vm1 = vcmask 261120   ;;  %s396_s24 = smov [#allocation7]   ;;  %vm230_vm2 = vcmask 64512  }
  0x28   :  { %281 = vmatprep.subr.bf16.mxu1 %v394_v0  ;;  %297 = vmatprep.mubr.msk.bf16.mxu1 %vm395_vm0, %v394_v0  ;;  %v49_v5 = vpack.c.bf16 %v48_v3, %v48_v3  ;;  %v312_v7 = vld [vmem:[#allocation5 + $0x10] sm:$0xff]   ;;  %v313_v8 = vld [vmem:[#allocation5 + $0x18] sm:$0xff]   ;;  %v314_v9 = vld [vmem:[#allocation5 + $0x20] sm:$0xff]   ;;  %s238_s25 = sshll.u32 %s396_s24, 4  ;;  %s239_s25 = int_to_ptr.vmem [resolvable:$true] %s238_s25 }
  0x29   :  { %274 = vmatpush3.bf16.msra.mxu0 %v308_v1  ;;  %282 = vmatpush3.bf16.msra.mxu1 %v310_v4  ;;  %v315_v10 = vld [vmem:[#allocation5 + $0x28] sm:$0xff]   ;;  %v316_v11 = vld [vmem:[#allocation5 + $0x30] sm:$0xff]   ;;  %v317_v12 = vld [vmem:[#allocation5 + $0x38] sm:$0xff]   ;;  %p367_p3 = scmp.lt.s32.totalorder %s239_s25, %s239_s25 }
  0x2a   :  { %275 = vmatprep.subr.bf16.mxu0 %v394_v0  ;;  %283 = vmatprep.subr.bf16.mxu1 %v394_v0  ;;  %v248_v13 = vld [vmem:[%s484_s2] ss:$0 sm:$0xff]  ;;  %s362_s2 = scalar_lea.vmem %s239_s25, 128 }
  0x2b   :  { %v252_v21 = vld [vmem:[%s486_s4] ss:$0 sm:$0xff]  ;;  %p363_p2 = scmp.ne.s32.totalorder %s239_s25, %s362_s2  ;;  %p368_p4 = scmp.lt.s32.totalorder %s362_s2, %s362_s2 }
  0x2d   :  { %276 = vmatpush3.bf16.msra.mxu0 %v309_v2  ;;  %284 = vmatpush3.bf16.msra.mxu1 %v311_v6  ;;  %p369_p5 = por %p368_p4, %p367_p3 }
  0x2e   :  { %285 = vmatprep.subr.bf16.mxu1 %v394_v0 }
  0x2f   :  { %p370_p6 = pnand %p369_p5, %p363_p2 }
  0x30   :  { %278 = vmatmul.mubr.msk.bf16.vlgmr.msra.gmra.mrb[0].mxu0 %vm73_vm1, %v49_v5 }
  0x31   :  { %286 = vmatpush3.bf16.msra.mxu1 %v312_v7 }
  0x32   :  { %287 = vmatprep.subr.bf16.mxu1 %v394_v0 }
  0x35   :  { %288 = vmatpush3.bf16.msra.mxu1 %v313_v8 }
  0x36   :  { %289 = vmatprep.subr.bf16.mxu1 %v394_v0 }
  0x39   :  { %290 = vmatpush3.bf16.msra.mxu1 %v314_v9 }
  0x3a   :  { %291 = vmatprep.subr.bf16.mxu1 %v394_v0 }
  0x3d   :  { %292 = vmatpush3.bf16.msra.mxu1 %v315_v10 }
  0x3e   :  { %293 = vmatprep.subr.bf16.mxu1 %v394_v0 }
  0x41   :  { %294 = vmatpush3.bf16.msra.mxu1 %v316_v11 }
  0x42   :  { %295 = vmatprep.subr.bf16.mxu1 %v394_v0 }
  0x45   :  { %296 = vmatpush3.bf16.msra.mxu1 %v317_v12 }
 0x103   :  { %v111_v14 = vpop.f32.mrb[0].mxu0 }
 0x104   :  { %v112_v15 = vadd.f32 %v248_v13, %v111_v14  ;;  %v279_v16 = vpop.f32.mrb[1].mxu0 }
 0x105   :  { %v114_v17 = vpop.f32.mrb[2].mxu0 }
 0x106   :  { %v117_v18 = vmax.f32 %v112_v15, 0.0  ;;  %v280_v19 = vpop.f32.mrb[3].mxu0 }
 0x108   :  { %v118_v20 = vpack.c.bf16 %v117_v18, %v117_v18 }
 0x10a   :  { %298 = vmatmul.mubr.bf16.vlgmr.msra.gmra.mrb[0].mxu1 %v118_v20 }
 0x1dd   :  { %v224_v22 = vpop.f32.mrb[0].mxu1 }
 0x1de   :  { %v225_v23 = vadd.f32 %v252_v21, %v224_v22  ;;  %v299_v24 = vpop.f32.mrb[1].mxu1 }
 0x1df   :  { %v227_v25 = vpop.f32.mrb[2].mxu1 }
 0x1e0   :  { %v300_v26 = vpop.f32.mrb[3].mxu1  ;;  %231 = vst.msk [vmem:[#allocation7] sm:$0xff] %vm230_vm2, %v225_v23 }
 0x1e1   :  { %373 = shalt.err (!%p370_p6)
}
 0x1e2   :  { %s374_s4 = scalar_lea.hbm %s487_s5, 128 }
 0x1e3   :  { %p375_p7 = scmp.ne.s32.totalorder %s487_s5, %s374_s4  ;;  %p378_p8 = scmp.lt.u32.totalorder %s374_s4, %s487_s5 }
 0x1e5   :  { %p380_p9 = pnand %p378_p8, %p375_p7 }
 0x1e7   :  { %383 = shalt.err (!%p380_p9)
}
 0x1e8   :  { %241 = dma.vmem_to_hbm [thread:$0]  %s239_s25, 128, %s487_s5, [#allocation4]  }
 0x1e9   :  { %388 = dma.done.wait [#allocation4], 128  }
 0x1ea   :  { %389 = vsyncadd [#allocation4], 4294967168 }
 0x1eb   :  { %245 = vsyncpa [#allocation3], 1 }
 0x1ec   :  { %246 = vsyncpa [#allocation6], 1 }
 0x1ed   :  { %247 = vsyncpa [#allocation4], 1 }

</bundles_post_ra>
